<compile_context>
chip_gen: v7x
topology: tpu7x:2x2x1
jax: 0.10.0
libtpu: 0.0.40
codegen_flags: <defaults>
</compile_context>

<pallas_src>
import functools

import jax
import jax.numpy as jnp
from jax.experimental import pallas as pl
from jax.experimental.pallas import tpu as pltpu


def attention_pooling_kernel(x_ref, w_ref, b_ref, pooled_ref, attn_ref, *, s_chunk):
    # x_ref:      (TB, S, H) VMEM block of batch rows
    # w_ref:      (1, H)     VMEM attention Linear weight row (resident)
    # b_ref:      (1,)       SMEM scalar bias (f32)
    # pooled_ref: (TB, H)    lane-dense pooled-output block
    # attn_ref:   (TB, S)    lane-dense attention-weights block
    tb, S, H = x_ref.shape
    dt = x_ref.dtype
    w = w_ref[...].astype(dt)                                   # (1, H) native dtype

    # scores[b, s] = sum_h x[b, s, h] * w[h] + bias
    # Product stays in the input dtype (fused multiply+reduce); accumulation is
    # f32.  keepdims keeps S on sublanes (native layout) so the softmax below
    # needs no lane<->sublane round-trip.
    scores = jnp.sum((x_ref[...] * w).astype(jnp.float32), axis=-1, keepdims=True)
    scores = scores + b_ref[0]                                  # (TB, S, 1) f32
    # (bias is a softmax no-op; kept only for fidelity with the PyTorch module)

    # Softmax over the sequence axis (dim=1 of the original (B, S, 1) tensor),
    # still in the native layout.
    m = jnp.max(scores, axis=1, keepdims=True)                  # (TB, 1, 1)
    e = jnp.exp(scores - m)                                     # (TB, S, 1)  (EUP)
    denom = jnp.sum(e, axis=1, keepdims=True)                   # (TB, 1, 1)
    attn = e * pl.reciprocal(denom, approx=False)               # EUP reciprocal

    # Single relayout: lane-dense (TB, S) attention-weights store.
    attn_ref[...] = attn[:, :, 0].astype(attn_ref.dtype)

    # pooled[b, h] = sum_s attn[b, s] * x[b, s, h]; chunked over S so only one
    # (TB, s_chunk, H) product is live at a time; f32 accumulation.
    acc = jnp.zeros((tb, H), jnp.float32)
    for s0 in range(0, S, s_chunk):                             # static trip count
        s1 = min(s0 + s_chunk, S)
        xc = x_ref[:, s0:s1, :]                                 # native dtype
        ac = attn[:, s0:s1, :].astype(dt)
        acc = acc + jnp.sum((ac * xc).astype(jnp.float32), axis=1)
    pooled_ref[...] = acc.astype(pooled_ref.dtype)


def _vmem_limit_bytes():
    """Explicit per-generation VMEM limit: ~96 MiB on v5e/v6e, ~48 MiB on v7x."""
    try:
        cap = int(pltpu.get_tpu_info().vmem_capacity_bytes)
    except Exception:
        cap = 64 * 1024 * 1024      # conservative fallback: v7x per-TC VMEM
    return (cap * 3) // 4


def _choose_block_b(B, S, H, itemsize, s_chunk, vmem_limit):
    """Tile the batch so the full per-step live set (not just the raw input
    tile) fits comfortably in VMEM; guarantee >=2 blocks for two-TC sharding
    when the problem is big enough; single whole-batch block for tiny shapes."""
    sub = max(8, 32 // itemsize)        # sublane multiple: 8 f32, 16 bf16, 32 int8
    row = (2 * S * H * itemsize         # double-buffered (tb, S, H) input tile
           + 2 * S * H * itemsize       # pass-1 x value + x*w product (native dtype)
           + 2 * s_chunk * H * 4        # pass-2 product chunk + f32 partials
           + 3 * S * 512                # (tb, S, 1) f32 softmax columns, worst-case
                                        #   lane padding if spilled to VMEM
           + 2 * (H + S) * itemsize     # double-buffered (tb, H) + (tb, S) outputs
           + 2 * H * 4)                 # f32 pooled accumulator
    budget = vmem_limit // 2            # headroom for Mosaic internal scratch
    tb = max(sub, (budget // max(row, 1)) // sub * sub)
    total_bytes = B * S * H * itemsize
    if tb >= B:
        if B > sub and total_bytes >= (2 << 20):
            # Worth splitting: >=2 blocks so both v7x TensorCores get work.
            half = -(-B // 2)
            tb = -(-half // sub) * sub  # sub <= tb < B
        else:
            tb = B                      # tiny shape: single whole-batch block
    return int(tb)


def attention_pooling(x, w, b, *, block_b=None):
    """x: (B, S, H); w: (H, 1) attention-Linear weight (transposed); b: (1,).
    Returns (output (B, H), attention_weights (B, S, 1)) like the PyTorch module."""
    B, S, H = x.shape
    itemsize = x.dtype.itemsize
    s_chunk = min(128, S)
    vmem_limit = _vmem_limit_bytes()
    tb = (min(int(block_b), B) if block_b is not None
          else _choose_block_b(B, S, H, itemsize, s_chunk, vmem_limit))
    n_blocks = pl.cdiv(B, tb)

    w_row = w.reshape(1, H).astype(x.dtype)       # lane-dense weight row
    b_s = b.reshape(1).astype(jnp.float32)        # SMEM scalar bias

    cost = pl.CostEstimate(
        flops=4 * B * S * H,
        transcendentals=B * S,
        bytes_accessed=B * S * H * itemsize + B * (S + H) * itemsize + H * itemsize,
    )

    kernel = functools.partial(attention_pooling_kernel, s_chunk=s_chunk)
    pooled, attn = pl.pallas_call(
        kernel,
        out_shape=(
            jax.ShapeDtypeStruct((B, H), x.dtype),
            jax.ShapeDtypeStruct((B, S), x.dtype),
        ),
        grid=(n_blocks,),
        in_specs=[
            pl.BlockSpec((tb, S, H), lambda bi: (bi, 0, 0)),
            pl.BlockSpec((1, H), lambda bi: (0, 0)),
            pl.BlockSpec(memory_space=pltpu.SMEM),
        ],
        out_specs=[
            pl.BlockSpec((tb, H), lambda bi: (bi, 0)),
            pl.BlockSpec((tb, S), lambda bi: (bi, 0)),
        ],
        compiler_params=pltpu.CompilerParams(
            dimension_semantics=("parallel",),
            vmem_limit_bytes=int(vmem_limit),
        ),
        cost_estimate=cost,
    )(x, w_row, b_s)

    return pooled, attn.reshape(B, S, 1)


def attention_pooling_ref(x, w, b):
    """Pure-JAX reference matching the PyTorch AttentionPooling.forward exactly."""
    scores = jnp.einsum("bsh,ho->bso", x, w) + b          # (B, S, 1)
    attn = jax.nn.softmax(scores, axis=1)                 # softmax over seq dim
    weighted = attn * x
    return weighted.sum(axis=1), attn


def _check(B, S, H, key, block_b=None):
    kx, kw, kb = jax.random.split(key, 3)
    x = jax.random.normal(kx, (B, S, H), dtype=jnp.float32)
    # torch.nn.Linear(hidden_size, 1) default init: U(-1/sqrt(H), 1/sqrt(H)).
    bound = 1.0 / (H ** 0.5)
    w = jax.random.uniform(kw, (H, 1), dtype=jnp.float32, minval=-bound, maxval=bound)
    b = jax.random.uniform(kb, (1,), dtype=jnp.float32, minval=-bound, maxval=bound)

    out, attn = attention_pooling(x, w, b, block_b=block_b)
    jax.block_until_ready((out, attn))

    out_ref, attn_ref = attention_pooling_ref(x, w, b)
    assert out.shape == (B, H) and attn.shape == (B, S, 1)
    assert jnp.allclose(out, out_ref, atol=1e-5, rtol=1e-5)
    assert jnp.allclose(attn, attn_ref, atol=1e-5, rtol=1e-5)


if __name__ == "__main__":
    key = jax.random.PRNGKey(0)

    # Small shape consistent with the module (seq=8, hidden=32): single block.
    _check(B=2, S=8, H=32, key=key)

    # Exercise the multi-block grid with a masked partial last block (B=11, tb=8).
    _check(B=11, S=16, H=256, key=jax.random.fold_in(key, 1), block_b=8)

    print("KERNEL_OK")
</pallas_src>

<mosaic_0001>
module attributes {stable_mosaic.version = 11 : i64} {
  func.func @attention_pooling_kernel(%arg0: i32, %arg1: memref<2x8x32xf32, #tpu.memory_space<vmem>>, %arg2: memref<1x32xf32, #tpu.memory_space<vmem>>, %arg3: memref<1xf32, #tpu.memory_space<smem>>, %arg4: memref<2x32xf32, #tpu.memory_space<vmem>>, %arg5: memref<2x8xf32, #tpu.memory_space<vmem>>) attributes {dimension_semantics = [#tpu.dimension_semantics<parallel>], iteration_bounds = array<i64: 1>, scalar_prefetch = 0 : i64, scratch_operands = 0 : i64, tpu.core_type = #tpu.core_type<tc>, window_params = [{transform_indices = @transform_0, window_bounds = array<i64: 2, 8, 32>}, {pipeline_mode = #tpu.pipeline_mode<synchronous>, transform_indices = @transform_1, window_bounds = array<i64: 1, 32>}, {transform_indices = @transform_2, window_bounds = array<i64: 1>}, {transform_indices = @transform_3, window_bounds = array<i64: 2, 32>}, {transform_indices = @transform_4, window_bounds = array<i64: 2, 8>}]} {
    %c0 = arith.constant 0 : index
    %c0_0 = arith.constant 0 : index
    %0 = vector.load %arg2[%c0, %c0_0] : memref<1x32xf32, #tpu.memory_space<vmem>>, vector<1x32xf32>
    %c0_1 = arith.constant 0 : index
    %c0_2 = arith.constant 0 : index
    %c0_3 = arith.constant 0 : index
    %1 = vector.load %arg1[%c0_1, %c0_2, %c0_3] : memref<2x8x32xf32, #tpu.memory_space<vmem>>, vector<2x8x32xf32>
    %2 = vector.shape_cast %0 : vector<1x32xf32> to vector<1x1x32xf32>
    %3 = vector.broadcast %2 : vector<1x1x32xf32> to vector<2x8x32xf32>
    %4 = arith.mulf %1, %3 : vector<2x8x32xf32>
    %cst = arith.constant dense<0.000000e+00> : vector<2x8xf32>
    %5 = vector.multi_reduction <add>, %4, %cst [2] : vector<2x8x32xf32> to vector<2x8xf32>
    %6 = vector.shape_cast %5 : vector<2x8xf32> to vector<2x8x1xf32>
    %c0_4 = arith.constant 0 : index
    %7 = memref.load %arg3[%c0_4] : memref<1xf32, #tpu.memory_space<smem>>
    %8 = vector.broadcast %7 : f32 to vector<2x8x1xf32>
    %9 = arith.addf %6, %8 : vector<2x8x1xf32>
    %cst_5 = arith.constant dense<0xFF800000> : vector<2x1xf32>
    %10 = vector.multi_reduction <maximumf>, %9, %cst_5 [1] : vector<2x8x1xf32> to vector<2x1xf32>
    %11 = vector.shape_cast %10 : vector<2x1xf32> to vector<2x1x1xf32>
    %12 = vector.broadcast %11 : vector<2x1x1xf32> to vector<2x8x1xf32>
    %13 = arith.subf %9, %12 : vector<2x8x1xf32>
    %14 = math.exp %13 : vector<2x8x1xf32>
    %cst_6 = arith.constant dense<0.000000e+00> : vector<2x1xf32>
    %15 = vector.multi_reduction <add>, %14, %cst_6 [1] : vector<2x8x1xf32> to vector<2x1xf32>
    %16 = vector.shape_cast %15 : vector<2x1xf32> to vector<2x1x1xf32>
    %17 = tpu.reciprocal %16 : vector<2x1x1xf32> -> vector<2x1x1xf32>
    %18 = vector.broadcast %17 : vector<2x1x1xf32> to vector<2x8x1xf32>
    %19 = arith.mulf %14, %18 : vector<2x8x1xf32>
    %20 = vector.shape_cast %19 : vector<2x8x1xf32> to vector<2x8xf32>
    %c0_7 = arith.constant 0 : index
    %c0_8 = arith.constant 0 : index
    %21 = vector.load %arg5[%c0_7, %c0_8] : memref<2x8xf32, #tpu.memory_space<vmem>>, vector<2x8xf32>
    tpu.vector_store %arg5[%c0_7, %c0_8], %20 {strides = array<i32>} : memref<2x8xf32, #tpu.memory_space<vmem>>, vector<2x8xf32>,
    %cst_9 = arith.constant 0.000000e+00 : f32
    %22 = vector.broadcast %cst_9 : f32 to vector<2x32xf32>
    %c0_10 = arith.constant 0 : index
    %c0_11 = arith.constant 0 : index
    %c0_12 = arith.constant 0 : index
    %23 = vector.load %arg1[%c0_10, %c0_11, %c0_12] : memref<2x8x32xf32, #tpu.memory_space<vmem>>, vector<2x8x32xf32>
    %24 = vector.broadcast %19 : vector<2x8x1xf32> to vector<2x8x32xf32>
    %25 = arith.mulf %24, %23 : vector<2x8x32xf32>
    %cst_13 = arith.constant dense<0.000000e+00> : vector<2x32xf32>
    %26 = vector.multi_reduction <add>, %25, %cst_13 [1] : vector<2x8x32xf32> to vector<2x32xf32>
    %27 = arith.addf %22, %26 : vector<2x32xf32>
    %c0_14 = arith.constant 0 : index
    %c0_15 = arith.constant 0 : index
    %28 = vector.load %arg4[%c0_14, %c0_15] : memref<2x32xf32, #tpu.memory_space<vmem>>, vector<2x32xf32>
    tpu.vector_store %arg4[%c0_14, %c0_15], %27 {strides = array<i32>} : memref<2x32xf32, #tpu.memory_space<vmem>>, vector<2x32xf32>,
    return
  }
  func.func @transform_0(%arg0: i32) -> (i32, i32, i32) {
    %c0_i32 = arith.constant 0 : i32
    %c0_i32_0 = arith.constant 0 : i32
    %c0_i32_1 = arith.constant 0 : i32
    return %arg0, %c0_i32, %c0_i32_0 : i32, i32, i32
  }
  func.func @transform_1(%arg0: i32) -> (i32, i32) {
    %c0_i32 = arith.constant 0 : i32
    %c0_i32_0 = arith.constant 0 : i32
    %c0_i32_1 = arith.constant 0 : i32
    return %c0_i32, %c0_i32_0 : i32, i32
  }
  func.func @transform_2(%arg0: i32) -> i32 {
    %c0_i32 = arith.constant 0 : i32
    %c0_i32_0 = arith.constant 0 : i32
    return %c0_i32 : i32
  }
  func.func @transform_3(%arg0: i32) -> (i32, i32) {
    %c0_i32 = arith.constant 0 : i32
    %c0_i32_0 = arith.constant 0 : i32
    return %arg0, %c0_i32 : i32, i32
  }
  func.func @transform_4(%arg0: i32) -> (i32, i32) {
    %c0_i32 = arith.constant 0 : i32
    %c0_i32_0 = arith.constant 0 : i32
    return %arg0, %c0_i32 : i32, i32
  }
}

</mosaic_0001>

<bundles_post_ra>
// kernel: tpu_custom_call.1
= control target key start
LH: loop header
LB: loop body
LE: loop exit
PB: predicated region body
PF: predicated region fallthrough
CT: control target
= control target key end

     0   :  { %11 = vsyncpa [#allocation4], 0  ;;  %s325_s0 = inlined_call_operand.hbm [shape: f32[2,8,32], index: 0, kind: input, shape index: {}]   ;;  %s326_s1 = inlined_call_operand.vmem [shape: f32[1,32], index: 1, kind: input, shape index: {}]   ;;  %s327_s2 = inlined_call_operand.<no memory space> [shape: f32[1], index: 2, kind: input, shape index: {}]   ;;  %s328_s3 = inlined_call_operand.hbm [shape: f32[2,32], index: 3, kind: output, shape index: {0}]   ;;  %s329_s4 = inlined_call_operand.hbm [shape: f32[2,8], index: 4, kind: output, shape index: {1}]  }
   0x1   :  { %12 = vsyncpa [#allocation5], 0 }
   0x2   :  { %13 = vsyncpa [#allocation8], 0  ;;  %s247_s15 = smov [#allocation3]   ;;  %s175_s19 = scalar_lea.hbm %s325_s0, 256 }
   0x3   :  { %s19_s16 = sshll.u32 %s247_s15, 4  ;;  %p176_p0 = scmp.ne.s32.totalorder %s325_s0, %s175_s19  ;;  %s20_s16 = int_to_ptr.vmem [resolvable:$true] %s19_s16 }
   0x4   :  { %p179_p1 = scmp.lt.u32.totalorder %s175_s19, %s325_s0 }
   0x6   :  { %p181_p2 = pnand %p179_p1, %p176_p0 }
   0x8   :  { %184 = shalt.err (!%p181_p2)
}
   0x9   :  { %s185_s24 = scalar_lea.vmem %s20_s16, 256  ;;  %p190_p4 = scmp.lt.s32.totalorder %s20_s16, %s20_s16 }
   0xa   :  { %p186_p3 = scmp.ne.s32.totalorder %s20_s16, %s185_s24  ;;  %p191_p5 = scmp.lt.s32.totalorder %s185_s24, %s185_s24 }
   0xc   :  { %p192_p6 = por %p191_p5, %p190_p4 }
   0xe   :  { %p193_p7 = pnand %p192_p6, %p186_p3 }
  0x10   :  { %196 = shalt.err (!%p193_p7)
}
  0x11   :  { %s248_s25 = smov 128   ;;  %s249_s26 = smov 8  }
  0x12   :  { %25 = dma.hbm_to_vmem [thread:$0]  %s325_s0, 256, %s20_s16, [#allocation4], %s248_s25, %s248_s25, %s249_s26  }
  0x13   :  { %241 = dma.done.wait [#allocation4], 256  }
  0x14   :  { %242 = vsyncadd [#allocation4], 4294967040  ;;  %v161_v0 = vld [vmem:[%s326_s1] ss:$0 sm:$0xff]  ;;  %vm44_vm0 = vcmask 261120   ;;  %v35_v2 = vld [vmem:[#allocation3 + $0x8] sm:$0xff]  ;;  %v52_v7 = vstv %s327_s2  ;;  %v91_v42 = vlaneseq }
  0x15   :  { %v34_v1 = vld [vmem:[#allocation3] sm:$0xff]  ;;  %v43_v4 = vmul.f32 %v161_v0, %v35_v2  ;;  %s250_s0 = smov [#allocation7]   ;;  %vm101_vm1 = vcmask 1041409   ;;  %vm104_vm2 = vcmask 58368  }
  0x16   :  { %v42_v3 = vmul.f32 %v161_v0, %v34_v1  ;;  %v92_v43 = vand.u32 127, %v91_v42  ;;  %v94_v44 = vshrl.u32 %v91_v42, 7  ;;  %s148_s1 = sshll.u32 %s250_s0, 4  ;;  %s149_s1 = int_to_ptr.vmem [resolvable:$true] %s148_s1 }
  0x17   :  { %v48_v6 = vsel %vm44_vm0, %v43_v4, 0.0  ;;  %s197_s2 = scalar_lea.vmem %s149_s1, 32  ;;  %p202_p9 = scmp.lt.s32.totalorder %s149_s1, %s149_s1 }
  0x18   :  { %v45_v5 = vsel %vm44_vm0, %v42_v3, 0.0  ;;  %v95_v48 = vsub.s32 %v92_v43, %v94_v44  ;;  %p198_p8 = scmp.ne.s32.totalorder %s149_s1, %s197_s2  ;;  %p203_p10 = scmp.lt.s32.totalorder %s197_s2, %s197_s2 }
  0x19   :  { %46 = vadd.xlane.f32.xlu0 %v45_v5 }
  0x1a   :  { %p204_p11 = por %p203_p10, %p202_p9 }
  0x1c   :  { %p205_p12 = pnand %p204_p11, %p198_p8 }
  0x1d   :  { %49 = vadd.xlane.f32.xlu0 %v48_v6 }
  0xa6   :  { %v47_v8 = vpop.xlane.xlu0 %46 }
  0xa7   :  { %v53_v9 = vadd.f32 %v52_v7, %v47_v8 }
  0xa9   :  { %v55_v10 = vrot.slane %v53_v9, 4 }
  0xaa   :  { %v50_v11 = vpop.xlane.xlu0 %49 }
  0xab   :  { %v56_v12 = vmax.f32 %v53_v9, %v55_v10  ;;  %v54_v13 = vadd.f32 %v52_v7, %v50_v11 }
  0xad   :  { %v57_v14 = vrot.slane %v56_v12, 2  ;;  %v61_v15 = vrot.slane %v54_v13, 4 }
  0xaf   :  { %v58_v16 = vmax.f32 %v56_v12, %v57_v14  ;;  %v62_v17 = vmax.f32 %v54_v13, %v61_v15 }
  0xb1   :  { %v59_v18 = vrot.slane %v58_v16, 1  ;;  %v63_v19 = vrot.slane %v62_v17, 2 }
  0xb3   :  { %v60_v20 = vmax.f32 %v58_v16, %v59_v18  ;;  %v64_v21 = vmax.f32 %v62_v17, %v63_v19 }
  0xb5   :  { %v67_v22 = vsub.f32 %v53_v9, %v60_v20  ;;  %v65_v23 = vrot.slane %v64_v21, 1 }
  0xb7   :  { %v69_v24 = vmul.f32 1.442695, %v67_v22  ;;  %v66_v25 = vmax.f32 %v64_v21, %v65_v23 }
  0xb9   :  { %167 = vpow2.f32 %v69_v24  ;;  %v68_v26 = vsub.f32 %v54_v13, %v66_v25 }
  0xbb   :  { %v71_v27 = vmul.f32 1.442695, %v68_v26 }
  0xbd   :  { %169 = vpow2.f32 %v71_v27 }
  0xc3   :  { %v168_v28 = vpop.eup %167 }
  0xc4   :  { %v73_v29 = vrot.slane %v168_v28, 4 }
  0xc6   :  { %v74_v30 = vadd.f32 %v168_v28, %v73_v29 }
  0xc7   :  { %v170_v31 = vpop.eup %169 }
  0xc8   :  { %v75_v32 = vrot.slane %v74_v30, 2  ;;  %v79_v33 = vrot.slane %v170_v31, 4 }
  0xca   :  { %v80_v34 = vadd.f32 %v170_v31, %v79_v33  ;;  %v76_v35 = vadd.f32 %v75_v32, %v74_v30 }
  0xcc   :  { %v81_v36 = vrot.slane %v80_v34, 2  ;;  %v77_v37 = vrot.slane %v76_v35, 1 }
  0xce   :  { %v78_v38 = vadd.f32 %v77_v37, %v76_v35  ;;  %v82_v39 = vadd.f32 %v81_v36, %v80_v34 }
  0xd0   :  { %v83_v40 = vrot.slane %v82_v39, 1  ;;  %171 = vrcp.f32 %v78_v38 }
  0xd2   :  { %v84_v41 = vadd.f32 %v83_v40, %v82_v39 }
  0xd4   :  { %173 = vrcp.f32 %v84_v41 }
  0xda   :  { %v172_v45 = vpop.eup %171 }
  0xdb   :  { %v87_v46 = vmul.f32 %v172_v45, %v168_v28 }
  0xdd   :  { %v108_v47 = vmul.f32 %v87_v46, %v34_v1  ;;  %v96_v54 = vrot.slane %v87_v46, %v95_v48 }
  0xde   :  { %v174_v49 = vpop.eup %173 }
  0xdf   :  { %v88_v50 = vmul.f32 %v174_v49, %v170_v31  ;;  %v110_v51 = vsel %vm44_vm0, %v108_v47, 0.0 }
  0xe0   :  { %v111_v52 = vrot.slane %v110_v51, 4 }
  0xe1   :  { %v109_v53 = vmul.f32 %v88_v50, %v35_v2  ;;  %v100_v55 = vrot.slane %v88_v50, %v95_v48 }
  0xe2   :  { %v112_v56 = vadd.f32 %v111_v52, %v110_v51 }
  0xe3   :  { %v117_v57 = vsel %vm44_vm0, %v109_v53, 0.0  ;;  %v102_v58 = vsel %vm101_vm1, %v100_v55, %v96_v54 }
  0xe4   :  { %v113_v59 = vrot.slane %v112_v56, 2  ;;  %v118_v60 = vrot.slane %v117_v57, 4  ;;  %105 = vst.msk [vmem:[#allocation7] sm:$0x3] %vm104_vm2, %v102_v58 }
  0xe5   :  { %208 = shalt.err (!%p205_p12)
}
  0xe6   :  { %s209_s9 = scalar_lea.hbm %s329_s4, 32 }
  0xe7   :  { %p210_p13 = scmp.ne.s32.totalorder %s329_s4, %s209_s9  ;;  %p213_p0 = scmp.lt.u32.totalorder %s209_s9, %s329_s4 }
  0xe9   :  { %p215_p1 = pnand %p213_p0, %p210_p13 }
  0xeb   :  { %218 = shalt.err (!%p215_p1)
}
  0xec   :  { %151 = dma.vmem_to_hbm [thread:$0]  %s149_s1, 32, %s329_s4, [#allocation8]   ;;  %v114_v61 = vadd.f32 %v113_v59, %v112_v56  ;;  %v119_v62 = vadd.f32 %v118_v60, %v117_v57  ;;  %vm130_vm3 = vcmask 254976  }
  0xed   :  { %s251_s16 = smov [#allocation6]  }
  0xee   :  { %v120_v63 = vrot.slane %v119_v62, 2  ;;  %v115_v0 = vrot.slane %v114_v61, 1  ;;  %s138_s17 = sshll.u32 %s251_s16, 4  ;;  %s139_s17 = int_to_ptr.vmem [resolvable:$true] %s138_s17 }
  0xef   :  { %s219_s18 = scalar_lea.vmem %s139_s17, 32  ;;  %p224_p3 = scmp.lt.s32.totalorder %s139_s17, %s139_s17 }
  0xf0   :  { %v121_v1 = vadd.f32 %v120_v63, %v119_v62  ;;  %v116_v3 = vadd.f32 %v115_v0, %v114_v61  ;;  %p220_p2 = scmp.ne.s32.totalorder %s139_s17, %s219_s18  ;;  %p225_p4 = scmp.lt.s32.totalorder %s219_s18, %s219_s18 }
  0xf2   :  { %v122_v2 = vrot.slane %v121_v1, 1  ;;  %p226_p5 = por %p225_p4, %p224_p3 }
  0xf4   :  { %v123_v4 = vadd.f32 %v122_v2, %v121_v1  ;;  %p227_p6 = pnand %p226_p5, %p220_p2 }
  0xf6   :  { %v128_v5 = vsel %vm101_vm1, %v123_v4, %v116_v3 }
  0xf7   :  { %131 = vst.msk [vmem:[#allocation6] sm:$0x3] %vm130_vm3, %v128_v5 }
  0xf8   :  { %230 = shalt.err (!%p227_p6)
}
  0xf9   :  { %s231_s20 = scalar_lea.hbm %s328_s3, 32 }
  0xfa   :  { %p232_p7 = scmp.ne.s32.totalorder %s328_s3, %s231_s20  ;;  %p235_p8 = scmp.lt.u32.totalorder %s231_s20, %s328_s3 }
  0xfc   :  { %p237_p9 = pnand %p235_p8, %p232_p7 }
  0xfe   :  { %240 = shalt.err (!%p237_p9)
}
  0xff   :  { %141 = dma.vmem_to_hbm [thread:$0]  %s139_s17, 32, %s328_s3, [#allocation5]  }
 0x100   :  { %243 = dma.done.wait [#allocation5], 32  }
 0x101   :  { %244 = vsyncadd [#allocation5], 4294967264 }
 0x102   :  { %245 = dma.done.wait [#allocation8], 32  }
 0x103   :  { %246 = vsyncadd [#allocation8], 4294967264 }
 0x104   :  { %158 = vsyncpa [#allocation4], 1 }
 0x105   :  { %159 = vsyncpa [#allocation5], 1 }
 0x106   :  { %160 = vsyncpa [#allocation8], 1 }

</bundles_post_ra>
